<compile_context>
chip_gen: v6e
topology: v6e:2x2x1
jax: 0.10.0
libtpu: 0.0.40
codegen_flags: <defaults>
</compile_context>

<pallas_src>
import functools
import math

import jax
import jax.numpy as jnp
from jax.experimental import pallas as pl
from jax.experimental.pallas import tpu as pltpu


# -----------------------------------------------------------------------------
# Kernel 1: LN1 + multi-head self-attention + residual          grid = (B,)
# -----------------------------------------------------------------------------
def attn_block_kernel(x_ref, g1_ref, b1_ref, wqkv_ref, wproj_ref, bproj_ref,
                      o_ref, *, num_heads, eps):
    x = x_ref[0]                                  # (N, C) f32
    N, C = x.shape
    hd = C // num_heads
    scale = float(hd) ** -0.5

    # Hoisted parameter loads (no repeated broadcasts).
    g1 = g1_ref[0]                                # (C,) f32
    b1 = b1_ref[0]
    bproj = bproj_ref[0]

    # ---- LayerNorm 1 (f32) ----
    mean = jnp.mean(x, axis=-1, keepdims=True)
    var = jnp.mean((x - mean) ** 2, axis=-1, keepdims=True)
    xn = (x - mean) * jax.lax.rsqrt(var + eps)
    xn = xn * g1 + b1

    # ---- QKV projection (bf16 MXU, f32 accumulation; qkv_bias=False) ----
    qkv = jnp.dot(xn.astype(jnp.bfloat16), wqkv_ref[...],
                  preferred_element_type=jnp.float32)        # (N, 3C) f32

    # ---- Per-head attention, output projection folded into the loop ----
    acc = jnp.zeros((N, C), jnp.float32)
    for h in range(num_heads):                    # static, unrolled
        lo, hi = h * hd, (h + 1) * hd
        qh = (qkv[:, lo:hi] * scale).astype(jnp.bfloat16)          # (N, hd)
        kh = qkv[:, C + lo:C + hi].astype(jnp.bfloat16)            # (N, hd)
        vh = qkv[:, 2 * C + lo:2 * C + hi].astype(jnp.bfloat16)    # (N, hd)

        # scores: contract the last axes directly (no explicit kh.T).
        s = jax.lax.dot_general(
            qh, kh, (((1,), (1,)), ((), ())),
            preferred_element_type=jnp.float32)                    # (N, N) f32

        s = s - jnp.max(s, axis=-1, keepdims=True)
        p = jnp.exp(s)
        inv_l = pl.reciprocal(jnp.sum(p, axis=-1, keepdims=True),
                              approx=True)                         # (N, 1)

        oh = jnp.dot(p.astype(jnp.bfloat16), vh,
                     preferred_element_type=jnp.float32)           # (N, hd)
        oh = oh * inv_l                                            # normalize output

        # Fold output projection: attn_out[:, lo:hi] @ Wproj[lo:hi, :]
        acc = acc + jnp.dot(oh.astype(jnp.bfloat16),
                            wproj_ref[lo:hi, :],
                            preferred_element_type=jnp.float32)    # (N, C)

    o_ref[0] = x + acc + bproj                    # residual 1 (f32)


# -----------------------------------------------------------------------------
# Kernel 2: LN2 + MLP (tanh-GELU) + residual        grid = (B, N // tn)
# -----------------------------------------------------------------------------
def mlp_block_kernel(x_ref, g2_ref, b2_ref, w1_ref, bias1_ref, w2_ref,
                     bias2_ref, o_ref, *, eps):
    x = x_ref[0]                                  # (tn, C) f32

    g2 = g2_ref[0]
    b2 = b2_ref[0]
    bias1 = bias1_ref[0]
    bias2 = bias2_ref[0]

    # ---- LayerNorm 2 (f32) ----
    mean = jnp.mean(x, axis=-1, keepdims=True)
    var = jnp.mean((x - mean) ** 2, axis=-1, keepdims=True)
    xn = (x - mean) * jax.lax.rsqrt(var + eps)
    xn = xn * g2 + b2

    # ---- MLP: fc1 -> tanh-GELU -> fc2 (bf16 MXU, f32 elementwise) ----
    h1 = jnp.dot(xn.astype(jnp.bfloat16), w1_ref[...],
                 preferred_element_type=jnp.float32) + bias1       # (tn, H)
    c = math.sqrt(2.0 / math.pi)
    h1 = 0.5 * h1 * (1.0 + jnp.tanh(c * (h1 + 0.044715 * h1 * h1 * h1)))
    h2 = jnp.dot(h1.astype(jnp.bfloat16), w2_ref[...],
                 preferred_element_type=jnp.float32) + bias2       # (tn, C)

    o_ref[0] = x + h2                             # residual 2


# -----------------------------------------------------------------------------
# Wrapper
# -----------------------------------------------------------------------------
def _pick_seq_tile(n, target=256):
    """Largest multiple-of-8 divisor of n that is <= target; else full n."""
    if n <= target or n % 8 != 0:
        return n
    for t in range(target - (target % 8), 0, -8):
        if n % t == 0:
            return t
    return n


def vit_block(x, params, *, num_heads, eps=1e-5):
    B, N, C = x.shape
    H = params["fc1_w"].shape[1]
    bf16 = jnp.bfloat16
    VMEM_LIMIT = 48 * 1024 * 1024

    # Weights go into the kernels as bf16 (halves DMA traffic & VMEM).
    wqkv = params["qkv_w"].astype(bf16)
    wproj = params["proj_w"].astype(bf16)
    w1 = params["fc1_w"].astype(bf16)
    w2 = params["fc2_w"].astype(bf16)

    # ---- Kernel 1: attention, grid over batch ----
    vec_c = pl.BlockSpec((1, C), lambda b: (0, 0))
    attn_call = pl.pallas_call(
        functools.partial(attn_block_kernel, num_heads=num_heads, eps=eps),
        out_shape=jax.ShapeDtypeStruct((B, N, C), jnp.float32),
        grid=(B,),
        in_specs=[
            pl.BlockSpec((1, N, C), lambda b: (b, 0, 0)),       # x
            vec_c, vec_c,                                       # ln1 gamma, beta
            pl.BlockSpec((C, 3 * C), lambda b: (0, 0)),         # qkv weight (bf16)
            pl.BlockSpec((C, C), lambda b: (0, 0)),             # proj weight (bf16)
            vec_c,                                              # proj bias
        ],
        out_specs=pl.BlockSpec((1, N, C), lambda b: (b, 0, 0)),
        compiler_params=pltpu.CompilerParams(
            dimension_semantics=("parallel",),
            vmem_limit_bytes=VMEM_LIMIT),
    )
    x1 = attn_call(x, params["g1"], params["b1"], wqkv, wproj, params["proj_b"])

    # ---- Kernel 2: MLP, grid over (batch, seq tiles) ----
    tn = _pick_seq_tile(N)
    nt = N // tn
    vec2_c = pl.BlockSpec((1, C), lambda b, n: (0, 0))
    vec2_h = pl.BlockSpec((1, H), lambda b, n: (0, 0))
    mlp_call = pl.pallas_call(
        functools.partial(mlp_block_kernel, eps=eps),
        out_shape=jax.ShapeDtypeStruct((B, N, C), jnp.float32),
        grid=(B, nt),
        in_specs=[
            pl.BlockSpec((1, tn, C), lambda b, n: (b, n, 0)),   # x1 tile
            vec2_c, vec2_c,                                     # ln2 gamma, beta
            pl.BlockSpec((C, H), lambda b, n: (0, 0)),          # fc1 weight (bf16)
            vec2_h,                                             # fc1 bias
            pl.BlockSpec((H, C), lambda b, n: (0, 0)),          # fc2 weight (bf16)
            vec2_c,                                             # fc2 bias
        ],
        out_specs=pl.BlockSpec((1, tn, C), lambda b, n: (b, n, 0)),
        compiler_params=pltpu.CompilerParams(
            dimension_semantics=("parallel", "parallel"),
            vmem_limit_bytes=VMEM_LIMIT),
    )
    return mlp_call(x1, params["g2"], params["b2"],
                    w1, params["fc1_b"], w2, params["fc2_b"])


# -----------------------------------------------------------------------------
# Pure-JAX f32 reference (mirrors the PyTorch module in eval mode)
# -----------------------------------------------------------------------------
def reference_block(x, params, *, num_heads, eps=1e-5):
    B, N, C = x.shape
    hd = C // num_heads
    scale = float(hd) ** -0.5

    def ln(v, g, b):
        m = jnp.mean(v, axis=-1, keepdims=True)
        s = jnp.mean((v - m) ** 2, axis=-1, keepdims=True)
        return (v - m) * jax.lax.rsqrt(s + eps) * g[0] + b[0]

    xn = ln(x, params["g1"], params["b1"])
    qkv = xn @ params["qkv_w"]
    q, k, v = jnp.split(qkv, 3, axis=-1)
    q = q.reshape(B, N, num_heads, hd).transpose(0, 2, 1, 3)
    k = k.reshape(B, N, num_heads, hd).transpose(0, 2, 1, 3)
    v = v.reshape(B, N, num_heads, hd).transpose(0, 2, 1, 3)
    attn = jax.nn.softmax(jnp.einsum("bhnd,bhmd->bhnm", q, k) * scale, axis=-1)
    ao = jnp.einsum("bhnm,bhmd->bhnd", attn, v).transpose(0, 2, 1, 3).reshape(B, N, C)
    x1 = x + ao @ params["proj_w"] + params["proj_b"][0]

    xn2 = ln(x1, params["g2"], params["b2"])
    h1 = xn2 @ params["fc1_w"] + params["fc1_b"][0]
    c = math.sqrt(2.0 / math.pi)
    h1 = 0.5 * h1 * (1.0 + jnp.tanh(c * (h1 + 0.044715 * h1 ** 3)))
    return x1 + h1 @ params["fc2_w"] + params["fc2_b"][0]


if __name__ == "__main__":
    B, N, C = 2, 8, 32
    num_heads = 4
    mlp_ratio = 4.0
    H = int(C * mlp_ratio)

    key = jax.random.PRNGKey(0)
    keys = jax.random.split(key, 10)

    x = jax.random.normal(keys[0], (B, N, C), dtype=jnp.float32)
    params = {
        "g1": jnp.ones((1, C), jnp.float32),
        "b1": jnp.zeros((1, C), jnp.float32),
        "qkv_w": 0.05 * jax.random.normal(keys[1], (C, 3 * C), jnp.float32),
        "proj_w": 0.05 * jax.random.normal(keys[2], (C, C), jnp.float32),
        "proj_b": 0.01 * jax.random.normal(keys[3], (1, C), jnp.float32),
        "g2": jnp.ones((1, C), jnp.float32),
        "b2": jnp.zeros((1, C), jnp.float32),
        "fc1_w": 0.05 * jax.random.normal(keys[4], (C, H), jnp.float32),
        "fc1_b": 0.01 * jax.random.normal(keys[5], (1, H), jnp.float32),
        "fc2_w": 0.05 * jax.random.normal(keys[6], (H, C), jnp.float32),
        "fc2_b": 0.01 * jax.random.normal(keys[7], (1, C), jnp.float32),
    }

    out = vit_block(x, params, num_heads=num_heads)
    out = jax.block_until_ready(out)

    ref = reference_block(x, params, num_heads=num_heads)
    assert out.shape == (B, N, C)
    # bf16 MXU matmuls + approx reciprocal loosen tolerance vs the f32 reference.
    assert jnp.allclose(out, ref, atol=2e-2, rtol=2e-2), "mismatch vs JAX reference"

    print("KERNEL_OK")
</pallas_src>

<mosaic_0001>
module attributes {stable_mosaic.version = 11 : i64} {
  func.func @attn_block_kernel(%arg0: i32, %arg1: memref<1x8x32xf32, #tpu.memory_space<vmem>>, %arg2: memref<1x32xf32, #tpu.memory_space<vmem>>, %arg3: memref<1x32xf32, #tpu.memory_space<vmem>>, %arg4: memref<32x96xbf16, #tpu.memory_space<vmem>>, %arg5: memref<32x32xbf16, #tpu.memory_space<vmem>>, %arg6: memref<1x32xf32, #tpu.memory_space<vmem>>, %arg7: memref<1x8x32xf32, #tpu.memory_space<vmem>>) attributes {dimension_semantics = [#tpu.dimension_semantics<parallel>], iteration_bounds = array<i64: 2>, scalar_prefetch = 0 : i64, scratch_operands = 0 : i64, tpu.core_type = #tpu.core_type<tc>, window_params = [{transform_indices = @transform_0, window_bounds = array<i64: 1, 8, 32>}, {pipeline_mode = #tpu.pipeline_mode<synchronous>, transform_indices = @transform_1, window_bounds = array<i64: 1, 32>}, {pipeline_mode = #tpu.pipeline_mode<synchronous>, transform_indices = @transform_2, window_bounds = array<i64: 1, 32>}, {pipeline_mode = #tpu.pipeline_mode<synchronous>, transform_indices = @transform_3, window_bounds = array<i64: 32, 96>}, {pipeline_mode = #tpu.pipeline_mode<synchronous>, transform_indices = @transform_4, window_bounds = array<i64: 32, 32>}, {pipeline_mode = #tpu.pipeline_mode<synchronous>, transform_indices = @transform_5, window_bounds = array<i64: 1, 32>}, {transform_indices = @transform_6, window_bounds = array<i64: 1, 8, 32>}]} {
    %c0 = arith.constant 0 : index
    %c0_0 = arith.constant 0 : index
    %c0_1 = arith.constant 0 : index
    %0 = vector.load %arg1[%c0, %c0_0, %c0_1] : memref<1x8x32xf32, #tpu.memory_space<vmem>>, vector<1x8x32xf32>
    %1 = vector.shape_cast %0 : vector<1x8x32xf32> to vector<8x32xf32>
    %c0_2 = arith.constant 0 : index
    %c0_3 = arith.constant 0 : index
    %2 = vector.load %arg2[%c0_2, %c0_3] : memref<1x32xf32, #tpu.memory_space<vmem>>, vector<1x32xf32>
    %3 = vector.shape_cast %2 : vector<1x32xf32> to vector<32xf32>
    %c0_4 = arith.constant 0 : index
    %c0_5 = arith.constant 0 : index
    %4 = vector.load %arg3[%c0_4, %c0_5] : memref<1x32xf32, #tpu.memory_space<vmem>>, vector<1x32xf32>
    %5 = vector.shape_cast %4 : vector<1x32xf32> to vector<32xf32>
    %c0_6 = arith.constant 0 : index
    %c0_7 = arith.constant 0 : index
    %6 = vector.load %arg6[%c0_6, %c0_7] : memref<1x32xf32, #tpu.memory_space<vmem>>, vector<1x32xf32>
    %7 = vector.shape_cast %6 : vector<1x32xf32> to vector<32xf32>
    %cst = arith.constant dense<0.000000e+00> : vector<8xf32>
    %8 = vector.multi_reduction <add>, %1, %cst [1] : vector<8x32xf32> to vector<8xf32>
    %9 = vector.shape_cast %8 : vector<8xf32> to vector<8x1xf32>
    %cst_8 = arith.constant 3.200000e+01 : f32
    %10 = vector.broadcast %cst_8 : f32 to vector<8x1xf32>
    %11 = arith.divf %9, %10 : vector<8x1xf32>
    %12 = vector.broadcast %11 : vector<8x1xf32> to vector<8x32xf32>
    %13 = arith.subf %1, %12 : vector<8x32xf32>
    %14 = arith.mulf %13, %13 : vector<8x32xf32>
    %cst_9 = arith.constant dense<0.000000e+00> : vector<8xf32>
    %15 = vector.multi_reduction <add>, %14, %cst_9 [1] : vector<8x32xf32> to vector<8xf32>
    %16 = vector.shape_cast %15 : vector<8xf32> to vector<8x1xf32>
    %cst_10 = arith.constant 3.200000e+01 : f32
    %17 = vector.broadcast %cst_10 : f32 to vector<8x1xf32>
    %18 = arith.divf %16, %17 : vector<8x1xf32>
    %19 = vector.broadcast %11 : vector<8x1xf32> to vector<8x32xf32>
    %20 = arith.subf %1, %19 : vector<8x32xf32>
    %cst_11 = arith.constant 9.99999974E-6 : f32
    %21 = vector.broadcast %cst_11 : f32 to vector<8x1xf32>
    %22 = arith.addf %18, %21 : vector<8x1xf32>
    %23 = math.rsqrt %22 : vector<8x1xf32>
    %24 = vector.broadcast %23 : vector<8x1xf32> to vector<8x32xf32>
    %25 = arith.mulf %20, %24 : vector<8x32xf32>
    %26 = vector.shape_cast %3 : vector<32xf32> to vector<1x32xf32>
    %27 = vector.broadcast %26 : vector<1x32xf32> to vector<8x32xf32>
    %28 = arith.mulf %25, %27 : vector<8x32xf32>
    %29 = vector.shape_cast %5 : vector<32xf32> to vector<1x32xf32>
    %30 = vector.broadcast %29 : vector<1x32xf32> to vector<8x32xf32>
    %31 = arith.addf %28, %30 : vector<8x32xf32>
    %32 = arith.truncf %31 : vector<8x32xf32> to vector<8x32xbf16>
    %c0_12 = arith.constant 0 : index
    %c0_13 = arith.constant 0 : index
    %33 = vector.load %arg4[%c0_12, %c0_13] : memref<32x96xbf16, #tpu.memory_space<vmem>>, vector<32x96xbf16>
    %cst_14 = arith.constant dense<0.000000e+00> : vector<8x96xf32>
    %34 = tpu.matmul %32, %33, %cst_14 {dimension_numbers = #tpu.dot_dimension_numbers<[1], [0], [0], [1], [0, 0, 1, 1], [], []>} : vector<8x32xbf16>, vector<32x96xbf16>, vector<8x96xf32> -> vector<8x96xf32>
    %cst_15 = arith.constant 0.000000e+00 : f32
    %35 = vector.broadcast %cst_15 : f32 to vector<8x32xf32>
    %36 = vector.extract_strided_slice %34 {offsets = [0, 0], sizes = [8, 8], strides = [1, 1]} : vector<8x96xf32> to vector<8x8xf32>
    %cst_16 = arith.constant 0.353553385 : f32
    %37 = vector.broadcast %cst_16 : f32 to vector<8x8xf32>
    %38 = arith.mulf %36, %37 : vector<8x8xf32>
    %39 = arith.truncf %38 : vector<8x8xf32> to vector<8x8xbf16>
    %40 = vector.extract_strided_slice %34 {offsets = [0, 32], sizes = [8, 8], strides = [1, 1]} : vector<8x96xf32> to vector<8x8xf32>
    %41 = arith.truncf %40 : vector<8x8xf32> to vector<8x8xbf16>
    %42 = vector.extract_strided_slice %34 {offsets = [0, 64], sizes = [8, 8], strides = [1, 1]} : vector<8x96xf32> to vector<8x8xf32>
    %43 = arith.truncf %42 : vector<8x8xf32> to vector<8x8xbf16>
    %cst_17 = arith.constant dense<0.000000e+00> : vector<8x8xf32>
    %44 = tpu.matmul %39, %41, %cst_17 {dimension_numbers = #tpu.dot_dimension_numbers<[1], [1], [0], [0], [0, 0, 1, 0], [], []>} : vector<8x8xbf16>, vector<8x8xbf16>, vector<8x8xf32> -> vector<8x8xf32>
    %cst_18 = arith.constant dense<0xFF800000> : vector<8xf32>
    %45 = vector.multi_reduction <maximumf>, %44, %cst_18 [1] : vector<8x8xf32> to vector<8xf32>
    %46 = vector.shape_cast %45 : vector<8xf32> to vector<8x1xf32>
    %47 = vector.broadcast %46 : vector<8x1xf32> to vector<8x8xf32>
    %48 = arith.subf %44, %47 : vector<8x8xf32>
    %49 = math.exp %48 : vector<8x8xf32>
    %cst_19 = arith.constant dense<0.000000e+00> : vector<8xf32>
    %50 = vector.multi_reduction <add>, %49, %cst_19 [1] : vector<8x8xf32> to vector<8xf32>
    %51 = vector.shape_cast %50 : vector<8xf32> to vector<8x1xf32>
    %52 = tpu.reciprocal %51 {approx = true} : vector<8x1xf32> -> vector<8x1xf32>
    %53 = arith.truncf %49 : vector<8x8xf32> to vector<8x8xbf16>
    %cst_20 = arith.constant dense<0.000000e+00> : vector<8x8xf32>
    %54 = tpu.matmul %53, %43, %cst_20 {dimension_numbers = #tpu.dot_dimension_numbers<[1], [0], [0], [1], [0, 0, 1, 1], [], []>} : vector<8x8xbf16>, vector<8x8xbf16>, vector<8x8xf32> -> vector<8x8xf32>
    %55 = vector.broadcast %52 : vector<8x1xf32> to vector<8x8xf32>
    %56 = arith.mulf %54, %55 : vector<8x8xf32>
    %57 = arith.truncf %56 : vector<8x8xf32> to vector<8x8xbf16>
    %c0_21 = arith.constant 0 : index
    %c0_22 = arith.constant 0 : index
    %58 = vector.load %arg5[%c0_21, %c0_22] : memref<32x32xbf16, #tpu.memory_space<vmem>>, vector<8x32xbf16>
    %cst_23 = arith.constant dense<0.000000e+00> : vector<8x32xf32>
    %59 = tpu.matmul %57, %58, %cst_23 {dimension_numbers = #tpu.dot_dimension_numbers<[1], [0], [0], [1], [0, 0, 1, 1], [], []>} : vector<8x8xbf16>, vector<8x32xbf16>, vector<8x32xf32> -> vector<8x32xf32>
    %60 = arith.addf %35, %59 : vector<8x32xf32>
    %61 = vector.extract_strided_slice %34 {offsets = [0, 8], sizes = [8, 8], strides = [1, 1]} : vector<8x96xf32> to vector<8x8xf32>
    %cst_24 = arith.constant 0.353553385 : f32
    %62 = vector.broadcast %cst_24 : f32 to vector<8x8xf32>
    %63 = arith.mulf %61, %62 : vector<8x8xf32>
    %64 = arith.truncf %63 : vector<8x8xf32> to vector<8x8xbf16>
    %65 = vector.extract_strided_slice %34 {offsets = [0, 40], sizes = [8, 8], strides = [1, 1]} : vector<8x96xf32> to vector<8x8xf32>
    %66 = arith.truncf %65 : vector<8x8xf32> to vector<8x8xbf16>
    %67 = vector.extract_strided_slice %34 {offsets = [0, 72], sizes = [8, 8], strides = [1, 1]} : vector<8x96xf32> to vector<8x8xf32>
    %68 = arith.truncf %67 : vector<8x8xf32> to vector<8x8xbf16>
    %cst_25 = arith.constant dense<0.000000e+00> : vector<8x8xf32>
    %69 = tpu.matmul %64, %66, %cst_25 {dimension_numbers = #tpu.dot_dimension_numbers<[1], [1], [0], [0], [0, 0, 1, 0], [], []>} : vector<8x8xbf16>, vector<8x8xbf16>, vector<8x8xf32> -> vector<8x8xf32>
    %cst_26 = arith.constant dense<0xFF800000> : vector<8xf32>
    %70 = vector.multi_reduction <maximumf>, %69, %cst_26 [1] : vector<8x8xf32> to vector<8xf32>
    %71 = vector.shape_cast %70 : vector<8xf32> to vector<8x1xf32>
    %72 = vector.broadcast %71 : vector<8x1xf32> to vector<8x8xf32>
    %73 = arith.subf %69, %72 : vector<8x8xf32>
    %74 = math.exp %73 : vector<8x8xf32>
    %cst_27 = arith.constant dense<0.000000e+00> : vector<8xf32>
    %75 = vector.multi_reduction <add>, %74, %cst_27 [1] : vector<8x8xf32> to vector<8xf32>
    %76 = vector.shape_cast %75 : vector<8xf32> to vector<8x1xf32>
    %77 = tpu.reciprocal %76 {approx = true} : vector<8x1xf32> -> vector<8x1xf32>
    %78 = arith.truncf %74 : vector<8x8xf32> to vector<8x8xbf16>
    %cst_28 = arith.constant dense<0.000000e+00> : vector<8x8xf32>
    %79 = tpu.matmul %78, %68, %cst_28 {dimension_numbers = #tpu.dot_dimension_numbers<[1], [0], [0], [1], [0, 0, 1, 1], [], []>} : vector<8x8xbf16>, vector<8x8xbf16>, vector<8x8xf32> -> vector<8x8xf32>
    %80 = vector.broadcast %77 : vector<8x1xf32> to vector<8x8xf32>
    %81 = arith.mulf %79, %80 : vector<8x8xf32>
    %82 = arith.truncf %81 : vector<8x8xf32> to vector<8x8xbf16>
    %c8 = arith.constant 8 : index
    %c0_29 = arith.constant 0 : index
    %83 = vector.load %arg5[%c8, %c0_29] : memref<32x32xbf16, #tpu.memory_space<vmem>>, vector<8x32xbf16>
    %cst_30 = arith.constant dense<0.000000e+00> : vector<8x32xf32>
    %84 = tpu.matmul %82, %83, %cst_30 {dimension_numbers = #tpu.dot_dimension_numbers<[1], [0], [0], [1], [0, 0, 1, 1], [], []>} : vector<8x8xbf16>, vector<8x32xbf16>, vector<8x32xf32> -> vector<8x32xf32>
    %85 = arith.addf %60, %84 : vector<8x32xf32>
    %86 = vector.extract_strided_slice %34 {offsets = [0, 16], sizes = [8, 8], strides = [1, 1]} : vector<8x96xf32> to vector<8x8xf32>
    %cst_31 = arith.constant 0.353553385 : f32
    %87 = vector.broadcast %cst_31 : f32 to vector<8x8xf32>
    %88 = arith.mulf %86, %87 : vector<8x8xf32>
    %89 = arith.truncf %88 : vector<8x8xf32> to vector<8x8xbf16>
    %90 = vector.extract_strided_slice %34 {offsets = [0, 48], sizes = [8, 8], strides = [1, 1]} : vector<8x96xf32> to vector<8x8xf32>
    %91 = arith.truncf %90 : vector<8x8xf32> to vector<8x8xbf16>
    %92 = vector.extract_strided_slice %34 {offsets = [0, 80], sizes = [8, 8], strides = [1, 1]} : vector<8x96xf32> to vector<8x8xf32>
    %93 = arith.truncf %92 : vector<8x8xf32> to vector<8x8xbf16>
    %cst_32 = arith.constant dense<0.000000e+00> : vector<8x8xf32>
    %94 = tpu.matmul %89, %91, %cst_32 {dimension_numbers = #tpu.dot_dimension_numbers<[1], [1], [0], [0], [0, 0, 1, 0], [], []>} : vector<8x8xbf16>, vector<8x8xbf16>, vector<8x8xf32> -> vector<8x8xf32>
    %cst_33 = arith.constant dense<0xFF800000> : vector<8xf32>
    %95 = vector.multi_reduction <maximumf>, %94, %cst_33 [1] : vector<8x8xf32> to vector<8xf32>
    %96 = vector.shape_cast %95 : vector<8xf32> to vector<8x1xf32>
    %97 = vector.broadcast %96 : vector<8x1xf32> to vector<8x8xf32>
    %98 = arith.subf %94, %97 : vector<8x8xf32>
    %99 = math.exp %98 : vector<8x8xf32>
    %cst_34 = arith.constant dense<0.000000e+00> : vector<8xf32>
    %100 = vector.multi_reduction <add>, %99, %cst_34 [1] : vector<8x8xf32> to vector<8xf32>
    %101 = vector.shape_cast %100 : vector<8xf32> to vector<8x1xf32>
    %102 = tpu.reciprocal %101 {approx = true} : vector<8x1xf32> -> vector<8x1xf32>
    %103 = arith.truncf %99 : vector<8x8xf32> to vector<8x8xbf16>
    %cst_35 = arith.constant dense<0.000000e+00> : vector<8x8xf32>
    %104 = tpu.matmul %103, %93, %cst_35 {dimension_numbers = #tpu.dot_dimension_numbers<[1], [0], [0], [1], [0, 0, 1, 1], [], []>} : vector<8x8xbf16>, vector<8x8xbf16>, vector<8x8xf32> -> vector<8x8xf32>
    %105 = vector.broadcast %102 : vector<8x1xf32> to vector<8x8xf32>
    %106 = arith.mulf %104, %105 : vector<8x8xf32>
    %107 = arith.truncf %106 : vector<8x8xf32> to vector<8x8xbf16>
    %c16 = arith.constant 16 : index
    %c0_36 = arith.constant 0 : index
    %108 = vector.load %arg5[%c16, %c0_36] : memref<32x32xbf16, #tpu.memory_space<vmem>>, vector<8x32xbf16>
    %cst_37 = arith.constant dense<0.000000e+00> : vector<8x32xf32>
    %109 = tpu.matmul %107, %108, %cst_37 {dimension_numbers = #tpu.dot_dimension_numbers<[1], [0], [0], [1], [0, 0, 1, 1], [], []>} : vector<8x8xbf16>, vector<8x32xbf16>, vector<8x32xf32> -> vector<8x32xf32>
    %110 = arith.addf %85, %109 : vector<8x32xf32>
    %111 = vector.extract_strided_slice %34 {offsets = [0, 24], sizes = [8, 8], strides = [1, 1]} : vector<8x96xf32> to vector<8x8xf32>
    %cst_38 = arith.constant 0.353553385 : f32
    %112 = vector.broadcast %cst_38 : f32 to vector<8x8xf32>
    %113 = arith.mulf %111, %112 : vector<8x8xf32>
    %114 = arith.truncf %113 : vector<8x8xf32> to vector<8x8xbf16>
    %115 = vector.extract_strided_slice %34 {offsets = [0, 56], sizes = [8, 8], strides = [1, 1]} : vector<8x96xf32> to vector<8x8xf32>
    %116 = arith.truncf %115 : vector<8x8xf32> to vector<8x8xbf16>
    %117 = vector.extract_strided_slice %34 {offsets = [0, 88], sizes = [8, 8], strides = [1, 1]} : vector<8x96xf32> to vector<8x8xf32>
    %118 = arith.truncf %117 : vector<8x8xf32> to vector<8x8xbf16>
    %cst_39 = arith.constant dense<0.000000e+00> : vector<8x8xf32>
    %119 = tpu.matmul %114, %116, %cst_39 {dimension_numbers = #tpu.dot_dimension_numbers<[1], [1], [0], [0], [0, 0, 1, 0], [], []>} : vector<8x8xbf16>, vector<8x8xbf16>, vector<8x8xf32> -> vector<8x8xf32>
    %cst_40 = arith.constant dense<0xFF800000> : vector<8xf32>
    %120 = vector.multi_reduction <maximumf>, %119, %cst_40 [1] : vector<8x8xf32> to vector<8xf32>
    %121 = vector.shape_cast %120 : vector<8xf32> to vector<8x1xf32>
    %122 = vector.broadcast %121 : vector<8x1xf32> to vector<8x8xf32>
    %123 = arith.subf %119, %122 : vector<8x8xf32>
    %124 = math.exp %123 : vector<8x8xf32>
    %cst_41 = arith.constant dense<0.000000e+00> : vector<8xf32>
    %125 = vector.multi_reduction <add>, %124, %cst_41 [1] : vector<8x8xf32> to vector<8xf32>
    %126 = vector.shape_cast %125 : vector<8xf32> to vector<8x1xf32>
    %127 = tpu.reciprocal %126 {approx = true} : vector<8x1xf32> -> vector<8x1xf32>
    %128 = arith.truncf %124 : vector<8x8xf32> to vector<8x8xbf16>
    %cst_42 = arith.constant dense<0.000000e+00> : vector<8x8xf32>
    %129 = tpu.matmul %128, %118, %cst_42 {dimension_numbers = #tpu.dot_dimension_numbers<[1], [0], [0], [1], [0, 0, 1, 1], [], []>} : vector<8x8xbf16>, vector<8x8xbf16>, vector<8x8xf32> -> vector<8x8xf32>
    %130 = vector.broadcast %127 : vector<8x1xf32> to vector<8x8xf32>
    %131 = arith.mulf %129, %130 : vector<8x8xf32>
    %132 = arith.truncf %131 : vector<8x8xf32> to vector<8x8xbf16>
    %c24 = arith.constant 24 : index
    %c0_43 = arith.constant 0 : index
    %133 = vector.load %arg5[%c24, %c0_43] : memref<32x32xbf16, #tpu.memory_space<vmem>>, vector<8x32xbf16>
    %cst_44 = arith.constant dense<0.000000e+00> : vector<8x32xf32>
    %134 = tpu.matmul %132, %133, %cst_44 {dimension_numbers = #tpu.dot_dimension_numbers<[1], [0], [0], [1], [0, 0, 1, 1], [], []>} : vector<8x8xbf16>, vector<8x32xbf16>, vector<8x32xf32> -> vector<8x32xf32>
    %135 = arith.addf %110, %134 : vector<8x32xf32>
    %136 = arith.addf %1, %135 : vector<8x32xf32>
    %137 = vector.shape_cast %7 : vector<32xf32> to vector<1x32xf32>
    %138 = vector.broadcast %137 : vector<1x32xf32> to vector<8x32xf32>
    %139 = arith.addf %136, %138 : vector<8x32xf32>
    %c0_45 = arith.constant 0 : index
    %c0_46 = arith.constant 0 : index
    %c0_47 = arith.constant 0 : index
    %140 = vector.load %arg7[%c0_45, %c0_46, %c0_47] : memref<1x8x32xf32, #tpu.memory_space<vmem>>, vector<1x8x32xf32>
    %141 = vector.shape_cast %140 : vector<1x8x32xf32> to vector<8x32xf32>
    %142 = vector.shape_cast %139 : vector<8x32xf32> to vector<1x8x32xf32>
    tpu.vector_store %arg7[%c0_45, %c0_46, %c0_47], %142 {strides = array<i32>} : memref<1x8x32xf32, #tpu.memory_space<vmem>>, vector<1x8x32xf32>,
    return
  }
  func.func @transform_0(%arg0: i32) -> (i32, i32, i32) {
    %c0_i32 = arith.constant 0 : i32
    %c0_i32_0 = arith.constant 0 : i32
    %c0_i32_1 = arith.constant 0 : i32
    return %arg0, %c0_i32, %c0_i32_0 : i32, i32, i32
  }
  func.func @transform_1(%arg0: i32) -> (i32, i32) {
    %c0_i32 = arith.constant 0 : i32
    %c0_i32_0 = arith.constant 0 : i32
    %c0_i32_1 = arith.constant 0 : i32
    return %c0_i32, %c0_i32_0 : i32, i32
  }
  func.func @transform_2(%arg0: i32) -> (i32, i32) {
    %c0_i32 = arith.constant 0 : i32
    %c0_i32_0 = arith.constant 0 : i32
    %c0_i32_1 = arith.constant 0 : i32
    return %c0_i32, %c0_i32_0 : i32, i32
  }
  func.func @transform_3(%arg0: i32) -> (i32, i32) {
    %c0_i32 = arith.constant 0 : i32
    %c0_i32_0 = arith.constant 0 : i32
    %c0_i32_1 = arith.constant 0 : i32
    return %c0_i32, %c0_i32_0 : i32, i32
  }
  func.func @transform_4(%arg0: i32) -> (i32, i32) {
    %c0_i32 = arith.constant 0 : i32
    %c0_i32_0 = arith.constant 0 : i32
    %c0_i32_1 = arith.constant 0 : i32
    return %c0_i32, %c0_i32_0 : i32, i32
  }
  func.func @transform_5(%arg0: i32) -> (i32, i32) {
    %c0_i32 = arith.constant 0 : i32
    %c0_i32_0 = arith.constant 0 : i32
    %c0_i32_1 = arith.constant 0 : i32
    return %c0_i32, %c0_i32_0 : i32, i32
  }
  func.func @transform_6(%arg0: i32) -> (i32, i32, i32) {
    %c0_i32 = arith.constant 0 : i32
    %c0_i32_0 = arith.constant 0 : i32
    %c0_i32_1 = arith.constant 0 : i32
    return %arg0, %c0_i32, %c0_i32_0 : i32, i32, i32
  }
}

</mosaic_0001>

<bundles_post_ra>
// kernel: tpu_custom_call.1
= control target key start
LH: loop header
LB: loop body
LE: loop exit
PB: predicated region body
PF: predicated region fallthrough
CT: control target
= control target key end

     0   :  { %s1872_s0 = inlined_call_operand.hbm [shape: f32[2,8,32], index: 0, kind: input, shape index: {}]   ;;  %s1873_s1 = inlined_call_operand.vmem [shape: f32[1,32], index: 1, kind: input, shape index: {}]   ;;  %s1874_s2 = inlined_call_operand.vmem [shape: f32[1,32], index: 2, kind: input, shape index: {}]   ;;  %s1875_s3 = inlined_call_operand.hbm [shape: bf16[32,96], index: 3, kind: input, shape index: {}]   ;;  %s1876_s4 = inlined_call_operand.hbm [shape: bf16[32,32], index: 4, kind: input, shape index: {}]   ;;  %s1877_s5 = inlined_call_operand.vmem [shape: f32[1,32], index: 5, kind: input, shape index: {}]   ;;  %s1878_s6 = inlined_call_operand.hbm [shape: f32[2,8,32], index: 6, kind: output, shape index: {}]  }
   0x1   :  { %1883 = sst [smem:[#allocation12_spill]] %s1875_s3 }
   0x2   :  { %11 = vsyncpa [#allocation3], 0 }
   0x3   :  { %13 = vsyncpa [#allocation3 + $0x1], 0 }
   0x4   :  { %14 = vsyncpa [#allocation6], 0 }
   0x5   :  { %15 = vsyncpa [#allocation4], 0 }
   0x6   :  { %17 = vsyncpa [#allocation4 + $0x1], 0  ;;  %s1588_s21 = smov 0   ;;  %s1590_s22 = smov 0  }
   0x7   :  { %s1592_s23 = smov 0   ;;  %s1594_s24 = smov 0  }
   0x8 LB: > { %s1609_s25 = sadd.s32 4294967295, %s1532_s24   ;;  %s1141_s26 = sadd.s32 4294967294, %s1532_s24   ;;  %s1532_s24 = sphi %s1594_s24, %s1902_s24   ;;  %s1528_s23 = sphi %s1592_s23, %s1901_s23   ;;  %s1524_s22 = sphi %s1590_s22, %s1900_s22   ;;  %s1520_s21 = sphi %s1588_s21, %s1899_s21  }
   0x9   : > { %p43_p0 = scmp.ne.s32.totalorder %s1524_s22, %s1520_s21  ;;  %p1879_p1 = scmp.eq.s32.totalorder %s1609_s25, 0 }
   0xa   : > { %p178_p3 = scmp.eq.s32.totalorder %s1141_s26, 1  ;;  %p1142_p5 = scmp.ge.s32.totalorder %s1532_s24, 1 }
   0xb   : > { %p1618_p4 = por %p1879_p1, %p43_p0  ;;  %p185_p7 = scmp.lt.s32.totalorder %s1532_s24, 3 }
   0xc   : > { %p1623_p6 = por %p178_p3, %p43_p0  ;;  %s1534_s30 = smov [#allocation5]  }
   0xd   : > { %s1884_s27 = scalar_select %p1618_p4, 1, 0 }
   0xe   : > { %s1885_s28 = scalar_select %p1623_p6, 1, 0 }
   0xf   : > { %p1628_p8 = pnand %p1142_p5, %p185_p7  ;;  %s203_s7 = sshll.u32 %s1534_s30, 4  ;;  %s204_s7 = int_to_ptr.vmem [resolvable:$true] %s203_s7 }
  0x10   : > { %s1535_s9 = smov [#allocation7]   ;;  %s1395_s11 = scalar_lea.vmem %s204_s7, 256 }
  0x11   : > { %s1886_s29 = scalar_select %p1628_p8, 1, 0 }
  0x12   : > { %p1294_p9 = pneg %p1628_p8  ;;  %s216_s10 = sshll.u32 %s1535_s9, 4  ;;  %s217_s10 = int_to_ptr.vmem [resolvable:$true] %s216_s10 }
  0x13   : > { %p1396_p13 = scmp.ne.s32.totalorder %s204_s7, %s1395_s11  ;;  %p1403_p5 = scmp.lt.s32.totalorder %s204_s7, %s204_s7 }
  0x14   : > { %p1637_p11 = pnand %p1294_p9, %p1879_p1  ;;  %p1404_p7 = scmp.lt.s32.totalorder %s1395_s11, %s1395_s11 }
  0x16   : > { %p1386_p12 = pneg %p1637_p11  ;;  %p1405_p10 = por %p1404_p7, %p1403_p5 }
  0x18   : > { %p1398_p0 = pnand %p1396_p13, %p1386_p12 }
  0x1a   : > { %p1399_p3 = pneg %p1398_p0 }
  0x1c   : > { %p1406_p9 = pnand %p1405_p10, %p1399_p3 }
  0x1e   : > { %1409 = shalt.err (!%p1406_p9)
}
  0x1f   : > { %s1536_s12 = smov 64   ;;  %s1537_s13 = smov 4  }
  0x20   : > { %s1888_s3 = sld [smem:[#allocation12_spill]]  ;;  %s1421_s16 = scalar_lea.vmem %s217_s10, 256 }
  0x21   : > { %p1422_p1 = scmp.ne.s32.totalorder %s217_s10, %s1421_s16  ;;  %p1429_p2 = scmp.lt.s32.totalorder %s217_s10, %s217_s10 }
  0x22   : > { %p1430_p6 = scmp.lt.s32.totalorder %s1421_s16, %s1421_s16 }
  0x23   : > { %p1424_p13 = pnand %p1422_p1, %p1386_p12 }
  0x24   : > { %p1431_p5 = por %p1430_p6, %p1429_p2 }
  0x25   : > { %p1425_p0 = pneg %p1424_p13 }
  0x26   : > { %1297 = dma.hbm_to_vmem [thread:$0]  (!%p1637_p11), %s1888_s3, 256, %s204_s7, [#allocation6], %s1536_s12, %s1536_s12, %s1537_s13  }
  0x27   : > { %p1432_p10 = pnand %p1431_p5, %p1425_p0 }
  0x29   : > { %1435 = shalt.err (!%p1432_p10)
}
  0x2a   : > { %1300 = dma.hbm_to_vmem [thread:$0]  (!%p1637_p11), %s1876_s4, 256, %s217_s10, [#allocation6], %s1536_s12, %s1536_s12, %s1537_s13  }
  0x2b   : > { %s1660_s19 = sadd.s32 1, %s1532_s24   ;;  %s30_s20 = sadd.s32 1, %s1528_s23 }
  0x2c   : > { %s27_s26 = ssub.s32 %s1532_s24, %s1660_s19  ;;  %p37_p1 = scmp.ne.s32.totalorder %s1528_s23, %s1524_s22 }
  0x2d   : > { %p28_p2 = scmp.eq.s32.totalorder %s27_s26, 0  ;;  %p38_p6 = scmp.eq.s32.totalorder %s1532_s24, 0 }
  0x2e   : > { %p1889_p12 = scmp.eq.s32.totalorder %s1609_s25, 1  ;;  %p1311_p7 = scmp.lt.s32.totalorder %s1532_s24, 2 }
  0x2f   : > { %s1676_s7 = scalar_select %p28_p2, %s1528_s23, %s30_s20  }
  0x30   : > { %p1670_p3 = por %p1889_p12, %p37_p1  ;;  %p39_p9 = por %p38_p6, %p37_p1 }
  0x31   : > { %s233_s8 = sand.u32 1, %s1528_s23   ;;  %s1147_s10 = sshll.u32 %s1532_s24, 7 }
  0x32   : > { %s1890_s30 = scalar_select %p1670_p3, 1, 0 }
  0x33   : > { %s1146_s9 = sshll.u32 %s233_s8, 3  ;;  %s1683_s13 = scalar_lea.hbm %s1872_s0, %s1147_s10 }
  0x34   : > { %s237_s14 = scalar_lea.vmem [#allocation2], %s1146_s9  ;;  %p1685_p11 = pnand %p1311_p7, %p39_p9 }
  0x35   : > { %s244_s15 = sshll.u32 %s237_s14, 4  ;;  %s234_s17 = scalar_lea.sflag [#allocation3], %s233_s8  ;;  %s245_s15 = int_to_ptr.vmem [resolvable:$true] %s244_s15 }
  0x36   : > { %s1436_s18 = scalar_lea.hbm %s1683_s13, 128  ;;  %p1438_p0 = pneg %p1685_p11 }
  0x37   : > { %p1437_p13 = scmp.ne.s32.totalorder %s1683_s13, %s1436_s18  ;;  %s1441_s10 = scalar_lea.hbm %s1872_s0, 256 }
  0x38   : > { %p1442_p1 = scmp.lt.s32.totalorder %s1683_s13, %s1872_s0  ;;  %p1443_p2 = scmp.lt.s32.totalorder %s1441_s10, %s1436_s18 }
  0x39   : > { %p1439_p5 = pnand %p1438_p0, %p1437_p13 }
  0x3a   : > { %p1444_p6 = por %p1443_p2, %p1442_p1 }
  0x3b   : > { %p1440_p10 = pneg %p1439_p5 }
  0x3d   : > { %p1445_p12 = pnand %p1444_p6, %p1440_p10 }
  0x3f   : > { %1448 = shalt.err (!%p1445_p12)
}
  0x40   : > { %s1449_s12 = scalar_lea.vmem %s245_s15, 128  ;;  %s1538_s8 = smov [#allocation2]  }
  0x41   : > { %p1450_p7 = scmp.ne.s32.totalorder %s245_s15, %s1449_s12  ;;  %s1454_s14 = sshll.u32 %s1538_s8, 4  ;;  %s1455_s14 = int_to_ptr.vmem [resolvable:$false] %s1454_s14 }
  0x42   : > { %s1456_s3 = scalar_lea.vmem %s1455_s14, 256  ;;  %p1457_p13 = scmp.lt.s32.totalorder %s245_s15, %s1455_s14 }
  0x43   : > { %p1452_p9 = pnand %p1450_p7, %p1438_p0  ;;  %p1458_p5 = scmp.lt.s32.totalorder %s1456_s3, %s1449_s12 }
  0x45   : > { %p1453_p3 = pneg %p1452_p9  ;;  %p1459_p4 = por %p1458_p5, %p1457_p13 }
  0x47   : > { %p1460_p8 = pnand %p1459_p4, %p1453_p3 }
  0x49   : > { %1463 = shalt.err (!%p1460_p8)
}
  0x4a   : > { %1304 = dma.hbm_to_vmem [thread:$0]  (!%p1685_p11), %s1683_s13, 128, %s245_s15, %s234_s17  }
  0x4b   : > { %p1892_p10 = scmp.ne.s32.totalorder %s1886_s29, 0 }
  0x4c   : > { %s1706_s18 = sand.u32 (!%p1892_p10), 1, %s1524_s22   ;;  %p1893_p4 = scmp.ne.s32.totalorder (!%p1892_p10), %s1884_s27, 0 }
  0x4d   : > { %253 = sbr.rel (%p1892_p10) target bundleno = 2401 (0x961), region = 44  ;;  %s1149_s20 = sshll.u32 (!%p1892_p10), %s1706_s18, 3 }
  0x4e   : > { %s256_s26 = scalar_lea.sflag (!%p1892_p10), [#allocation3], %s1706_s18  ;;  %s259_s3 = scalar_lea.vmem (!%p1892_p10), [#allocation2], %s1149_s20 }
  0x52   : > { %1507 = dma.done.wait (%p1893_p4), %s256_s26, 128  }
  0x53   : > { %1509 = vsyncadd (%p1893_p4), %s256_s26, 4294967168  ;;  %p1894_p8 = scmp.eq.s32.totalorder %s1609_s25, 0 }
  0x55   : > { %1511 = dma.done.wait (%p1894_p8), [#allocation6], 512   ;;  %p1895_p3 = pmov %p1894_p8 }
  0x56   : > { %vm301_vm0 = vcmask 261120   ;;  %v1720_v0 = vld [vmem:[%s259_s3] sm:$0xff]  ;;  %v1364_v7 = vld [vmem:[#allocation5 + $0x8] sm:$0xff]   ;;  %v1539_v8 = vmov 0.0   ;;  %vm1540_vm1 = vmmov 0   ;;  %v1365_v9 = vld [vmem:[#allocation5] sm:$0xff]  }
  0x57   : > { %1513 = vsyncadd (%p1895_p3), [#allocation6], 4294966784  ;;  %v302_v1 = vsel %vm301_vm0, %v1720_v0, 0.0  ;;  %1202 = vmatprep.subr.bf16.mxu0 %v1539_v8  ;;  %1206 = vmatprep.mubr.msk.bf16.mxu0 %vm1540_vm1, %v1539_v8  ;;  %v1153_v14 = vld [vmem:[%s1873_s1] ss:$0 sm:$0xff]  ;;  %s1541_s16 = smov 96  }
  0x58   : > { %303 = vadd.xlane.f32.xlu0 %v302_v1  ;;  %1203 = vmatpush3.bf16.msra.mxu0 %v1364_v7  ;;  %v1154_v16 = vld [vmem:[%s1874_s2] ss:$0 sm:$0xff]  ;;  %s1542_s17 = smov 120   ;;  %s1543_s10 = smov 88   ;;  %vm396_vm2 = vcmask 64512   ;;  %vm459_vm3 = vcmask 1043456  }
  0x59   : > { %1210 = vmatprep.subr.bf16.mxu1 %v1539_v8  ;;  %1204 = vmatprep.subr.bf16.mxu0 %v1539_v8  ;;  %s1544_s11 = smov 64   ;;  %s1545_s9 = smov 56   ;;  %v505_v58 = vld [vmem:[#allocation7] sm:$0xf]  ;;  %v618_v60 = vld [vmem:[#allocation7 + $0x4] sm:$0xf] }
  0x5a   : > { %1212 = vmatprep.mubr.msk.bf16.mxu1 %vm1540_vm1, %v1539_v8  ;;  %s1546_s12 = smov 80   ;;  %s1547_s8 = smov 112   ;;  %v669_v59 = vsel %vm459_vm3, %v505_v58, 0  ;;  %v623_v61 = vsel %vm459_vm3, %v618_v60, 0 }
  0x5b   : > { %s1548_s14 = smov 104   ;;  %s1549_s26 = smov 48  }
  0x5c   : > { %1205 = vmatpush3.bf16.msra.mxu0 %v1365_v9  ;;  %s1550_s3 = smov 72   ;;  %s1551_s27 = smov 40  }
  0x5d   : > { %1216 = vmatprep.subr.bf16.mxu0 %v1539_v8  ;;  %s1172_s15 = sshll.u32 %s1609_s25, 7  ;;  %p1896_p0 = scmp.ne.s32.totalorder %s1890_s30, 0 }
  0x5e   : > { %s1552_s25 = smov [#allocation8]  }
  0xe1   : > { %v304_v2 = vpop.xlane.xlu0 %303 }
  0xe2   : > { %v306_v3 = vmul.f32 0.03125, %v304_v2 }
  0xe4   : > { %v307_v4 = vsub.f32 %v1720_v0, %v306_v3 }
  0xe6   : > { %v308_v5 = vmul.f32 %v307_v4, %v307_v4 }
  0xe8   : > { %v309_v6 = vsel %vm301_vm0, %v308_v5, 0.0 }
  0xe9   : > { %310 = vadd.xlane.f32.xlu0 %v309_v6 }
 0x172   : > { %v311_v10 = vpop.xlane.xlu0 %310 }
 0x173   : > { %v312_v11 = vmul.f32 0.03125, %v311_v10 }
 0x175   : > { %v313_v12 = vadd.f32 1e-05, %v312_v11 }
 0x177   : > { %1366 = vrsqrt.f32 %v313_v12 }
 0x184   : > { %v1367_v13 = vpop.eup %1366 }
 0x185   : > { %v315_v15 = vmul.f32 %v1367_v13, %v307_v4 }
 0x187   : > { %v322_v17 = vmul.f32 %v1153_v14, %v315_v15 }
 0x189   : > { %v329_v18 = vadd.f32 %v1154_v16, %v322_v17 }
 0x18b   : > { %v330_v19 = vpack.c.bf16 %v329_v18, %v329_v18 }
 0x18d   : > { %1207 = vmatmul.mubr.msk.bf16.vlgmr.msra.gmra.mxu0 %vm301_vm0, %v330_v19 }
 0x18e   : > { %1218 = vmatprep.mubr.msk.bf16.mxu0 %vm1540_vm1, %v1539_v8 }
 0x24d   : > { %v384_v20 = vpop.f32.mrf.mxu0 }
 0x24e   : > { %v390_v21 = vmul.f32 0.35355338, %v384_v20  ;;  %v1743_v22 = vpack.c.bf16 %v384_v20, %v384_v20 }
 0x24f   : > { %v1208_v23 = vpop.f32.mrf.mxu0 }
 0x250   : > { %v1745_v24 = vpack.c.bf16 %v390_v21, %v390_v21  ;;  %394 = vrot.lane.b32.xlu1 %v1743_v22, %s1541_s16  ;;  %s295_s16 = scalar_lea.vmem [#allocation8], %s1149_s20  ;;  %s1468_s20 = sshll.u32 %s1552_s25, 4  ;;  %s1469_s20 = int_to_ptr.vmem [resolvable:$false] %s1468_s20 }
 0x251   : > { %v387_v25 = vpop.f32.mrf.mxu0 }
 0x252   : > { %507 = vrot.lane.b32.xlu0 %v1745_v24, %s1542_s17  ;;  %s1052_s17 = sshll.u32 %s295_s16, 4  ;;  %s1053_s17 = int_to_ptr.vmem [resolvable:$true] %s1052_s17 }
 0x253   : > { %v1209_v26 = vpop.f32.mrf.mxu0  ;;  %p1471_p6 = scmp.lt.s32.totalorder %s1053_s17, %s1469_s20 }
 0x254   : > { %509 = vrot.lane.b32.xlu1 %v1743_v22, %s1543_s10 }
 0x2c2   : > { %v395_v27 = vpop.permute.xlu1 %394 }
 0x2c3   : > { %v401_v28 = vsel %vm396_vm2, %v395_v27, 0 }
 0x2c4   : > { %1211 = vmatpush3.bf16.xpose.msra.mxu1 %v401_v28  ;;  %v508_v31 = vpop.permute.xlu0 %507 }
 0x2c5   : > { %1222 = vmatprep.subr.bf16.mxu1 %v1539_v8 }
 0x2c6   : > { %v510_v29 = vpop.permute.xlu1 %509 }
 0x2c7   : > { %v515_v30 = vsel %vm396_vm2, %v510_v29, 0 }
 0x2cb   : > { %1213 = vmatmul.mubr.msk.bf16.vlgmr.msra.gmra.mxu1 %vm396_vm2, %v1745_v24 }
 0x2cc   : > { %1223 = vmatpush3.bf16.xpose.msra.mxu1 %v515_v30  ;;  %1224 = vmatprep.mubr.msk.bf16.mxu1 %vm1540_vm1, %v1539_v8 }
 0x2cd   : > { %1234 = vmatprep.subr.bf16.mxu1 %v1539_v8 }
 0x2d3   : > { %1225 = vmatmul.mubr.msk.bf16.vlgmr.msra.gmra.mxu1 %vm396_vm2, %v508_v31 }
 0x2d4   : > { %1236 = vmatprep.mubr.msk.bf16.mxu1 %vm1540_vm1, %v1539_v8  ;;  %1235 = vmatpush3.bf16.msra.mxu1 %v623_v61 }
 0x2d5   : > { %1246 = vmatprep.subr.bf16.mxu1 %v1539_v8 }
 0x38b   : > { %v437_v32 = vpop.f32.mrf.mxu1 }
 0x38c   : > { %v443_v33 = vsel %vm396_vm2, %v437_v32, -inf }
 0x38d   : > { %444 = vmax.xlane.f32.xlu1 %v443_v33  ;;  %v1214_v34 = vpop.f32.mrf.mxu1 }
 0x38f   : > { %v440_v35 = vpop.f32.mrf.mxu1 }
 0x391   : > { %v1215_v36 = vpop.f32.mrf.mxu1 }
 0x393   : > { %v551_v37 = vpop.f32.mrf.mxu1 }
 0x394   : > { %v557_v38 = vsel %vm396_vm2, %v551_v37, -inf }
 0x395   : > { %558 = vmax.xlane.f32.xlu0 %v557_v38  ;;  %v1226_v39 = vpop.f32.mrf.mxu1 }
 0x397   : > { %v554_v40 = vpop.f32.mrf.mxu1 }
 0x399   : > { %v1227_v41 = vpop.f32.mrf.mxu1 }
 0x39e   : > { %454 = vrot.lane.b32.xlu1 %v1743_v22, %s1544_s11 }
 0x3ab   : > { %568 = vrot.lane.b32.xlu0 %v1743_v22, %s1545_s9  ;;  %s1834_s9 = scalar_lea.hbm %s1878_s6, %s1172_s15 }
 0x3af   : > { %713 = vrot.lane.b32.xlu0 %v1743_v22, %s1546_s12  ;;  %s1039_s12 = scalar_lea.sflag [#allocation4], %s1706_s18 }
 0x3b3   : > { %711 = vrot.lane.b32.xlu0 %v1745_v24, %s1547_s8  ;;  %s1464_s8 = scalar_lea.vmem %s1053_s17, 128 }
 0x3b4   : > { %p1465_p11 = scmp.ne.s32.totalorder %s1053_s17, %s1464_s8 }
 0x3b6   : > { %p1466_p1 = pnand %p1465_p11, %p1896_p0 }
 0x3b8   : > { %p1467_p2 = pneg %p1466_p1 }
 0x416   : > { %v445_v42 = vpop.xlane.xlu1 %444 }
 0x417   : > { %v446_v43 = vsub.f32 %v437_v32, %v445_v42 }
 0x419   : > { %v447_v44 = vmul.f32 1.442695, %v446_v43 }
 0x41a   : > { %v455_v45 = vpop.permute.xlu1 %454 }
 0x41b   : > { %1368 = vpow2.f32 %v447_v44  ;;  %v461_v46 = vsel %vm459_vm3, %v455_v45, 0  ;;  %v822_v45 = vld [vmem:[#allocation7 + $0x8] sm:$0xf] }
 0x41c   : > { %1217 = vmatpush3.bf16.msra.mxu0 %v461_v46  ;;  %v827_v46 = vsel %vm459_vm3, %v822_v45, 0 }
 0x41d   : > { %1228 = vmatprep.subr.bf16.mxu0 %v1539_v8 }
 0x41e   : > { %v559_v47 = vpop.xlane.xlu0 %558 }
 0x41f   : > { %v560_v48 = vsub.f32 %v551_v37, %v559_v47 }
 0x421   : > { %v561_v49 = vmul.f32 1.442695, %v560_v48 }
 0x422   : > { %v569_v51 = vpop.permute.xlu0 %568 }
 0x423   : > { %1370 = vpow2.f32 %v561_v49  ;;  %v574_v54 = vsel %vm459_vm3, %v569_v51, 0 }
 0x426   : > { %v714_v62 = vpop.permute.xlu0 %713 }
 0x427   : > { %v719_v19 = vsel %vm396_vm2, %v714_v62, 0 }
 0x428   : > { %v1369_v50 = vpop.eup %1368 }
 0x429   : > { %v449_v52 = vsel %vm396_vm2, %v1369_v50, 0.0  ;;  %v453_v53 = vpack.c.bf16 %v1369_v50, %v1369_v50 }
 0x42a   : > { %450 = vadd.xlane.f32.xlu0 %v449_v52  ;;  %v712_v63 = vpop.permute.xlu0 %711 }
 0x42b   : > { %1219 = vmatmul.mubr.msk.bf16.vlgmr.msra.gmra.mxu0 %vm396_vm2, %v453_v53 }
 0x42c   : > { %1229 = vmatpush3.bf16.msra.mxu0 %v574_v54  ;;  %1230 = vmatprep.mubr.msk.bf16.mxu0 %vm1540_vm1, %v1539_v8 }
 0x42d   : > { %1240 = vmatprep.subr.bf16.mxu0 %v1539_v8 }
 0x430   : > { %v1371_v55 = vpop.eup %1370 }
 0x431   : > { %v563_v56 = vsel %vm396_vm2, %v1371_v55, 0.0  ;;  %v567_v57 = vpack.c.bf16 %v1371_v55, %v1371_v55 }
 0x432   : > { %564 = vadd.xlane.f32.xlu1 %v563_v56 }
 0x433   : > { %1231 = vmatmul.mubr.msk.bf16.vlgmr.msra.gmra.mxu0 %vm396_vm2, %v567_v57 }
 0x434   : > { %1242 = vmatprep.mubr.msk.bf16.mxu0 %vm1540_vm1, %v1539_v8  ;;  %1241 = vmatpush3.bf16.msra.mxu0 %v669_v59 }
 0x435   : > { %1252 = vmatprep.subr.bf16.mxu0 %v1539_v8 }
 0x440   : > { %870 = vrot.lane.b32.xlu0 %v1745_v24, %s1548_s14  ;;  %s1470_s14 = scalar_lea.vmem %s1469_s20, 256 }
 0x441   : > { %p1472_p12 = scmp.lt.s32.totalorder %s1470_s14, %s1464_s8 }
 0x443   : > { %772 = vrot.lane.b32.xlu1 %v1743_v22, %s1549_s26  ;;  %p1473_p7 = por %p1472_p12, %p1471_p6 }
 0x445   : > { %p1474_p9 = pnand %p1473_p7, %p1467_p2 }
 0x4b3   : > { %v451_v1 = vpop.xlane.xlu0 %450 }
 0x4b4   : > { %1372 = vrcp.f32 %v451_v1 }
 0x4b7   : > { %v871_v44 = vpop.permute.xlu0 %870 }
 0x4bb   : > { %v565_v2 = vpop.xlane.xlu1 %564 }
 0x4bc   : > { %1374 = vrcp.f32 %v565_v2 }
 0x4bf   : > { %v773_v6 = vpop.permute.xlu1 %772 }
 0x4c0   : > { %v778_v11 = vsel %vm459_vm3, %v773_v6, 0 }
 0x4c1   : > { %v1373_v3 = vpop.eup %1372 }
 0x4c9   : > { %v1375_v13 = vpop.eup %1374 }
 0x4eb   : > { %v497_v4 = vpop.f32.mrf.mxu0 }
 0x4ec   : > { %v503_v5 = vmul.f32 %v1373_v3, %v497_v4  ;;  %v981_v4 = vld [vmem:[#allocation7 + $0xc] sm:$0xf] }
 0x4ed   : > { %v1220_v7 = vpop.f32.mrf.mxu0 }
 0x4ee   : > { %v504_v9 = vpack.c.bf16 %v503_v5, %v503_v5 }
 0x4ef   : > { %v500_v10 = vpop.f32.mrf.mxu0 }
 0x4f0   : > { %1243 = vmatmul.mubr.msk.bf16.vlgmr.msra.gmra.mxu0 %vm396_vm2, %v504_v9 }
 0x4f1   : > { %1253 = vmatpush3.bf16.msra.mxu0 %v778_v11  ;;  %v1221_v12 = vpop.f32.mrf.mxu0  ;;  %1254 = vmatprep.mubr.msk.bf16.mxu0 %vm1540_vm1, %v1539_v8 }
 0x4f2   : > { %1264 = vmatprep.subr.bf16.mxu0 %v1539_v8 }
 0x4f3   : > { %v610_v14 = vpop.f32.mrf.mxu0 }
 0x4f4   : > { %v616_v15 = vmul.f32 %v1375_v13, %v610_v14 }
 0x4f5   : > { %v1232_v16 = vpop.f32.mrf.mxu0 }
 0x4f6   : > { %v617_v17 = vpack.c.bf16 %v616_v15, %v616_v15 }
 0x4f7   : > { %v613_v18 = vpop.f32.mrf.mxu0 }
 0x4f8   : > { %1237 = vmatmul.mubr.msk.bf16.vlgmr.msra.gmra.mxu1 %vm396_vm2, %v617_v17 }
 0x4f9   : > { %1247 = vmatpush3.bf16.xpose.msra.mxu1 %v719_v19  ;;  %v1233_v20 = vpop.f32.mrf.mxu0  ;;  %1248 = vmatprep.mubr.msk.bf16.mxu1 %vm1540_vm1, %v1539_v8 }
 0x4fa   : > { %1258 = vmatprep.subr.bf16.mxu1 %v1539_v8 }
 0x500   : > { %1249 = vmatmul.mubr.msk.bf16.vlgmr.msra.gmra.mxu1 %vm396_vm2, %v712_v63 }
 0x501   : > { %1260 = vmatprep.mubr.msk.bf16.mxu1 %vm1540_vm1, %v1539_v8  ;;  %1259 = vmatpush3.bf16.msra.mxu1 %v827_v46 }
 0x502   : > { %1270 = vmatprep.subr.bf16.mxu1 %v1539_v8 }
 0x5b0   : > { %v705_v21 = vpop.f32.mrf.mxu0 }
 0x5b2   : > { %v1244_v23 = vpop.f32.mrf.mxu0 }
 0x5b4   : > { %v708_v24 = vpop.f32.mrf.mxu0 }
 0x5b6   : > { %v1245_v25 = vpop.f32.mrf.mxu0 }
 0x5b8   : > { %v659_v26 = vpop.f32.mrf.mxu1 }
 0x5b9   : > { %v1798_v27 = vadd.f32 %v705_v21, %v659_v26  ;;  %v1170_v21 = vld [vmem:[%s1877_s5] ss:$0 sm:$0xff] }
 0x5ba   : > { %v1238_v28 = vpop.f32.mrf.mxu1 }
 0x5bc   : > { %v662_v29 = vpop.f32.mrf.mxu1 }
 0x5be   : > { %v1239_v30 = vpop.f32.mrf.mxu1 }
 0x5c0   : > { %v755_v31 = vpop.f32.mrf.mxu1 }
 0x5c1   : > { %v761_v32 = vsel %vm396_vm2, %v755_v31, -inf }
 0x5c2   : > { %762 = vmax.xlane.f32.xlu1 %v761_v32  ;;  %v1250_v33 = vpop.f32.mrf.mxu1 }
 0x5c4   : > { %v758_v34 = vpop.f32.mrf.mxu1 }
 0x5c6   : > { %v1251_v35 = vpop.f32.mrf.mxu1 }
 0x5d3   : > { %872 = vrot.lane.b32.xlu1 %v1743_v22, %s1550_s3 }
 0x64b   : > { %v763_v36 = vpop.xlane.xlu1 %762 }
 0x64c   : > { %v764_v37 = vsub.f32 %v755_v31, %v763_v36 }
 0x64e   : > { %v765_v38 = vmul.f32 1.442695, %v764_v37 }
 0x64f   : > { %v873_v40 = vpop.permute.xlu1 %872 }
 0x650   : > { %1376 = vpow2.f32 %v765_v38  ;;  %v878_v43 = vsel %vm396_vm2, %v873_v40, 0 }
 0x65d   : > { %v1377_v39 = vpop.eup %1376 }
 0x65e   : > { %v767_v41 = vsel %vm396_vm2, %v1377_v39, 0.0  ;;  %v771_v42 = vpack.c.bf16 %v1377_v39, %v1377_v39 }
 0x65f   : > { %768 = vadd.xlane.f32.xlu1 %v767_v41 }
 0x660   : > { %1255 = vmatmul.mubr.msk.bf16.vlgmr.msra.gmra.mxu0 %vm396_vm2, %v771_v42 }
 0x661   : > { %1265 = vmatpush3.bf16.xpose.msra.mxu0 %v878_v43  ;;  %1266 = vmatprep.mubr.msk.bf16.mxu0 %vm1540_vm1, %v1539_v8 }
 0x662   : > { %1276 = vmatprep.subr.bf16.mxu0 %v1539_v8 }
 0x668   : > { %1267 = vmatmul.mubr.msk.bf16.vlgmr.msra.gmra.mxu0 %vm396_vm2, %v871_v44 }
 0x669   : > { %1278 = vmatprep.mubr.msk.bf16.mxu0 %vm1540_vm1, %v1539_v8 }
 0x670   : > { %931 = vrot.lane.b32.xlu1 %v1743_v22, %s1551_s27 }
 0x6e8   : > { %v769_v47 = vpop.xlane.xlu1 %768 }
 0x6e9   : > { %1378 = vrcp.f32 %v769_v47 }
 0x6ec   : > { %v932_v51 = vpop.permute.xlu1 %931 }
 0x6ed   : > { %v937_v55 = vsel %vm459_vm3, %v932_v51, 0 }
 0x6f6   : > { %v1379_v48 = vpop.eup %1378 }
 0x720   : > { %v814_v49 = vpop.f32.mrf.mxu0 }
 0x721   : > { %v820_v50 = vmul.f32 %v1379_v48, %v814_v49 }
 0x722   : > { %v1256_v52 = vpop.f32.mrf.mxu0 }
 0x723   : > { %v821_v53 = vpack.c.bf16 %v820_v50, %v820_v50 }
 0x724   : > { %v817_v54 = vpop.f32.mrf.mxu0 }
 0x725   : > { %1261 = vmatmul.mubr.msk.bf16.vlgmr.msra.gmra.mxu1 %vm396_vm2, %v821_v53 }
 0x726   : > { %1271 = vmatpush3.bf16.msra.mxu1 %v937_v55  ;;  %v1257_v22 = vpop.f32.mrf.mxu0  ;;  %1272 = vmatprep.mubr.msk.bf16.mxu1 %vm1540_vm1, %v1539_v8  ;;  %v986_v8 = vsel %vm459_vm3, %v981_v4, 0 }
 0x727   : > { %1277 = vmatpush3.bf16.msra.mxu0 %v986_v8 }
 0x728   : > { %v914_v56 = vpop.f32.mrf.mxu0 }
 0x729   : > { %v920_v57 = vsel %vm396_vm2, %v914_v56, -inf }
 0x72a   : > { %921 = vmax.xlane.f32.xlu0 %v920_v57  ;;  %v1268_v58 = vpop.f32.mrf.mxu0 }
 0x72c   : > { %v917_v59 = vpop.f32.mrf.mxu0 }
 0x72e   : > { %v1269_v60 = vpop.f32.mrf.mxu0 }
 0x7b3   : > { %v922_v61 = vpop.xlane.xlu0 %921 }
 0x7b4   : > { %v923_v62 = vsub.f32 %v914_v56, %v922_v61 }
 0x7b6   : > { %v924_v63 = vmul.f32 1.442695, %v923_v62 }
 0x7b8   : > { %1380 = vpow2.f32 %v924_v63 }
 0x7c5   : > { %v1381_v1 = vpop.eup %1380 }
 0x7c6   : > { %v926_v2 = vsel %vm396_vm2, %v1381_v1, 0.0  ;;  %v930_v3 = vpack.c.bf16 %v1381_v1, %v1381_v1 }
 0x7c7   : > { %927 = vadd.xlane.f32.xlu0 %v926_v2 }
 0x7c8   : > { %1273 = vmatmul.mubr.msk.bf16.vlgmr.msra.gmra.mxu1 %vm396_vm2, %v930_v3 }
 0x7e5   : > { %v863_v5 = vpop.f32.mrf.mxu1 }
 0x7e6   : > { %v869_v6 = vadd.f32 %v863_v5, %v1798_v27 }
 0x7e7   : > { %v1262_v7 = vpop.f32.mrf.mxu1 }
 0x7e9   : > { %v866_v9 = vpop.f32.mrf.mxu1 }
 0x7eb   : > { %v1263_v10 = vpop.f32.mrf.mxu1 }
 0x850   : > { %v928_v11 = vpop.xlane.xlu0 %927 }
 0x851   : > { %1382 = vrcp.f32 %v928_v11 }
 0x85e   : > { %v1383_v12 = vpop.eup %1382 }
 0x888   : > { %v973_v13 = vpop.f32.mrf.mxu1 }
 0x889   : > { %v979_v14 = vmul.f32 %v1383_v12, %v973_v13 }
 0x88a   : > { %v1274_v15 = vpop.f32.mrf.mxu1 }
 0x88b   : > { %v980_v16 = vpack.c.bf16 %v979_v14, %v979_v14 }
 0x88c   : > { %v976_v17 = vpop.f32.mrf.mxu1 }
 0x88d   : > { %1279 = vmatmul.mubr.msk.bf16.vlgmr.msra.gmra.mxu0 %vm396_vm2, %v980_v16 }
 0x88e   : > { %v1275_v18 = vpop.f32.mrf.mxu1 }
 0x94d   : > { %v1022_v19 = vpop.f32.mrf.mxu0 }
 0x94e   : > { %v1028_v20 = vadd.f32 %v1022_v19, %v869_v6 }
 0x94f   : > { %v1280_v23 = vpop.f32.mrf.mxu0 }
 0x950   : > { %v1029_v24 = vadd.f32 %v1028_v20, %v1720_v0 }
 0x951   : > { %v1025_v25 = vpop.f32.mrf.mxu0 }
 0x952   : > { %v1036_v26 = vadd.f32 %v1170_v21, %v1029_v24 }
 0x953   : > { %v1281_v27 = vpop.f32.mrf.mxu0 }
 0x954   : > { %1037 = vst.msk [vmem:[%s295_s16] sm:$0xff] %vm301_vm0, %v1036_v26 }
 0x955   : > { %1477 = shalt.err (!%p1474_p9)
}
 0x956   : > { %s1478_s26 = scalar_lea.hbm %s1834_s9, 128  ;;  %s1482_s27 = scalar_lea.hbm %s1878_s6, 256 }
 0x957   : > { %p1479_p13 = scmp.ne.s32.totalorder %s1834_s9, %s1478_s26  ;;  %p1483_p4 = scmp.lt.s32.totalorder %s1834_s9, %s1878_s6 }
 0x958   : > { %p1484_p8 = scmp.lt.s32.totalorder %s1482_s27, %s1478_s26 }
 0x959   : > { %p1480_p5 = pnand %p1479_p13, %p1896_p0 }
 0x95a   : > { %p1485_p3 = por %p1484_p8, %p1483_p4 }
 0x95b   : > { %p1481_p10 = pneg %p1480_p5 }
 0x95d   : > { %p1486_p11 = pnand %p1485_p3, %p1481_p10 }
 0x95f   : > { %1489 = shalt.err (!%p1486_p11)
}
 0x960   : > { %1292 = dma.vmem_to_hbm [thread:$0]  (%p1896_p0), %s1053_s17, 128, %s1834_s9, %s1039_s12  }
 0x961 PF: > { %s1064_s15 = sand.u32 1, %s1520_s21   ;;  %p1897_p1 = scmp.ne.s32.totalorder %s1885_s28, 0 }
 0x962   : > { %p1898_p2 = scmp.ge.s32.totalorder %s1532_s24, 2  ;;  %s1065_s16 = scalar_lea.sflag [#allocation4], %s1064_s15 }
 0x964   : > { %p1306_p6 = pnand %p1898_p2, %p1897_p1 }
 0x966   : > { %p1307_p12 = pneg %p1306_p6 }
 0x968   : > { %1515 = dma.done.wait (%p1307_p12), %s1065_s16, 128  }
 0x969   : > { %1517 = vsyncadd (%p1307_p12), %s1065_s16, 4294967168  ;;  %p20_p7 = scmp.ge.s32.totalorder %s1660_s19, 4   ;;  %s1899_s21 = smov %s1524_s22 }
 0x96a   : > { %s1900_s22 = smov %s1528_s23  ;;  %s1901_s23 = smov %s1676_s7 }
 0x96b   : > { %s1902_s24 = smov %s1660_s19  ;;  %22 = sbr.rel (!%p20_p7) target bundleno = 8 (0x8), region = 97 }
 0x970   :  { %1070 = vsyncpa [#allocation3], 1 }
 0x971   :  { %1072 = vsyncpa [#allocation3 + $0x1], 1 }
 0x972   :  { %1073 = vsyncpa [#allocation6], 1 }
 0x973   :  { %1074 = vsyncpa [#allocation4], 1 }
 0x974   :  { %1076 = vsyncpa [#allocation4 + $0x1], 1 }

</bundles_post_ra>
